<compile_context>
chip_gen: v7x
topology: tpu7x:2x2x1
jax: 0.10.0
libtpu: 0.0.40
codegen_flags: <defaults>
</compile_context>

<pallas_src>
import functools

import jax
import jax.numpy as jnp
from jax.experimental import pallas as pl
from jax.experimental.pallas import tpu as pltpu

NEG_SLOPE = 0.01  # PyTorch LeakyReLU default negative_slope
LANE = 128
SUBLANE_T = 16    # sublane-safe batch rounding for both f32 (8) and bf16 (16)


def _leaky_relu(v):
    # Equivalent to where(v > 0, v, slope*v) for 0 < slope < 1; one fewer VALU op.
    return jnp.maximum(v, NEG_SLOPE * v)


def _round_up(n, m):
    return ((n + m - 1) // m) * m


def _choose_block_b(B):
    # Split the batch into >=2 tiles when possible (v7x megacore), but cap the
    # tile at 1024 so per-step work amortizes pipeline overhead while the
    # working set stays a few MiB.
    half = _round_up(max(1, -(-B // 2)), SUBLANE_T)
    return max(SUBLANE_T, min(1024, half))


def mlp_kernel(x_ref, w1_ref, b1_ref, w2_ref, b2_ref,
               w3_ref, b3_ref, w4_ref, b4_ref, o_ref):
    mxu_dt = w1_ref.dtype  # f32 or bf16; accumulation always f32
    # linear_layer_1: Linear -> LeakyReLU -> Linear -> LeakyReLU
    h = jnp.dot(x_ref[...], w1_ref[...],
                preferred_element_type=jnp.float32) + b1_ref[...]
    h = _leaky_relu(h)
    h = jnp.dot(h.astype(mxu_dt), w2_ref[...],
                preferred_element_type=jnp.float32) + b2_ref[...]
    h = _leaky_relu(h)
    # torch.sigmoid — lax.logistic lowers onto the EUP. Padded hidden lanes are
    # 0 before the sigmoid and become 0.5, but they only ever multiply zero
    # rows of w3, so real outputs are unaffected.
    h = jax.nn.sigmoid(h)
    # linear_layer_2: Linear -> LeakyReLU -> Linear -> LeakyReLU
    h = jnp.dot(h.astype(mxu_dt), w3_ref[...],
                preferred_element_type=jnp.float32) + b3_ref[...]
    h = _leaky_relu(h)
    h = jnp.dot(h.astype(mxu_dt), w4_ref[...],
                preferred_element_type=jnp.float32) + b4_ref[...]
    h = _leaky_relu(h)
    o_ref[...] = h.astype(o_ref.dtype)


def pad_params(params, mxu_dtype=jnp.float32):
    """Pad hidden dims to 128 lanes once, outside the per-call path.

    x's feature dim (K of the first matmul) and the final output dim are left
    unpadded; only the hidden (lane) dims are padded. Weights optionally cast
    to bf16 for the MXU (v6e/v7x); biases stay f32.
    """
    w1, b1, w2, b2, w3, b3, w4, b4 = params
    f_in, hidden = w1.shape
    f_out = w4.shape[1]
    Hp = _round_up(hidden, LANE)

    pad2 = lambda a, r, c: jnp.pad(a, ((0, r - a.shape[0]), (0, c - a.shape[1])))

    w1p = pad2(w1, f_in, Hp).astype(mxu_dtype)   # (f_in, Hp)  K unpadded
    w2p = pad2(w2, Hp, Hp).astype(mxu_dtype)     # (Hp, Hp)
    w3p = pad2(w3, Hp, Hp).astype(mxu_dtype)     # (Hp, Hp)
    w4p = pad2(w4, Hp, f_out).astype(mxu_dtype)  # (Hp, f_out) N unpadded
    b1p = pad2(b1, 1, Hp)
    b2p = pad2(b2, 1, Hp)
    b3p = pad2(b3, 1, Hp)
    b4p = b4                                     # (1, f_out)
    return (w1p, b1p, w2p, b2p, w3p, b3p, w4p, b4p)


@functools.partial(jax.jit, static_argnames=("block_b",))
def nn_forward(x, padded_params, *, block_b=None):
    w1p, b1p, w2p, b2p, w3p, b3p, w4p, b4p = padded_params
    B, f_in = x.shape
    f_out = w4p.shape[1]
    mxu_dt = w1p.dtype

    if block_b is None:
        block_b = _choose_block_b(B)
    Bp = _round_up(B, block_b)

    xp = x.astype(mxu_dt)
    if Bp != B:
        xp = jnp.pad(xp, ((0, Bp - B), (0, 0)))

    grid = (Bp // block_b,)

    # Weights/biases: constant index_map -> resident in VMEM, DMA'd once.
    # Single-buffered: the second pipeline buffer would be dead weight.
    resident = lambda a: pl.BlockSpec(a.shape, lambda i: (0, 0),
                                      pipeline_mode=pl.Buffered(1))

    out = pl.pallas_call(
        mlp_kernel,
        out_shape=jax.ShapeDtypeStruct((Bp, f_out), jnp.float32),
        grid=grid,
        in_specs=[pl.BlockSpec((block_b, f_in), lambda i: (i, 0)),
                  resident(w1p), resident(b1p),
                  resident(w2p), resident(b2p),
                  resident(w3p), resident(b3p),
                  resident(w4p), resident(b4p)],
        out_specs=pl.BlockSpec((block_b, f_out), lambda i: (i, 0)),
        compiler_params=pltpu.CompilerParams(
            dimension_semantics=("parallel",),        # megacore split on v7x
            vmem_limit_bytes=32 * 1024 * 1024),       # headroom on v5e's 16 MiB default
    )(xp, w1p, b1p, w2p, b2p, w3p, b3p, w4p, b4p)

    return out[:B] if Bp != B else out


def init_params(key, input_shape, hidden_units, output_shape):
    """Deterministic init mimicking PyTorch nn.Linear default U(-1/sqrt(fan_in), ...)."""
    dims = [(input_shape, hidden_units),
            (hidden_units, hidden_units),
            (hidden_units, hidden_units),
            (hidden_units, output_shape)]
    params = []
    for (fan_in, fan_out) in dims:
        key, kw, kb = jax.random.split(key, 3)
        bound = 1.0 / (fan_in ** 0.5)
        w = jax.random.uniform(kw, (fan_in, fan_out), jnp.float32, -bound, bound)
        b = jax.random.uniform(kb, (1, fan_out), jnp.float32, -bound, bound)
        params += [w, b]
    return tuple(params)


def reference_forward(x, params):
    (w1, b1, w2, b2, w3, b3, w4, b4) = params
    h = _leaky_relu(x @ w1 + b1)
    h = _leaky_relu(h @ w2 + b2)
    h = jax.nn.sigmoid(h)
    h = _leaky_relu(h @ w3 + b3)
    h = _leaky_relu(h @ w4 + b4)
    return h


if __name__ == "__main__":
    # Breast-cancer-style shapes: 30 input features, 32 hidden, 1 output.
    input_shape, hidden_units, output_shape = 30, 32, 1

    key = jax.random.PRNGKey(0)
    key, kx1, kx2 = jax.random.split(key, 3)
    params = init_params(key, input_shape, hidden_units, output_shape)

    # Pad/cast params ONCE, outside the per-call path.
    padded_f32 = pad_params(params)

    # Small batch (single tile).
    x_small = jax.random.normal(kx1, (8, input_shape), jnp.float32)
    out_small = jax.block_until_ready(nn_forward(x_small, padded_f32))
    ref_small = reference_forward(x_small, params)
    assert out_small.shape == (8, output_shape)
    assert jnp.allclose(out_small, ref_small, atol=1e-5, rtol=1e-5)

    # Larger ragged batch: exercises the batch grid (2 tiles -> both v7x TCs busy).
    x_big = jax.random.normal(kx2, (260, input_shape), jnp.float32)
    out_big = jax.block_until_ready(nn_forward(x_big, padded_f32))
    ref_big = reference_forward(x_big, params)
    assert out_big.shape == (260, output_shape)
    assert jnp.allclose(out_big, ref_big, atol=1e-5, rtol=1e-5)

    # Optional bf16 MXU path (v6e/v7x native rate, f32 accumulation) with
    # relaxed tolerance against the f32 reference.
    padded_bf16 = pad_params(params, mxu_dtype=jnp.bfloat16)
    out_bf16 = jax.block_until_ready(nn_forward(x_big, padded_bf16))
    assert out_bf16.shape == (260, output_shape)
    assert jnp.allclose(out_bf16, ref_big, atol=3e-2, rtol=3e-2)

    print("KERNEL_OK")
</pallas_src>

<mosaic_0001>
module attributes {stable_mosaic.version = 11 : i64} {
  func.func @mlp_kernel(%arg0: i32, %arg1: memref<16x30xf32, #tpu.memory_space<vmem>>, %arg2: memref<30x128xf32, #tpu.memory_space<vmem>>, %arg3: memref<1x128xf32, #tpu.memory_space<vmem>>, %arg4: memref<128x128xf32, #tpu.memory_space<vmem>>, %arg5: memref<1x128xf32, #tpu.memory_space<vmem>>, %arg6: memref<128x128xf32, #tpu.memory_space<vmem>>, %arg7: memref<1x128xf32, #tpu.memory_space<vmem>>, %arg8: memref<128x1xf32, #tpu.memory_space<vmem>>, %arg9: memref<1x1xf32, #tpu.memory_space<vmem>>, %arg10: memref<16x1xf32, #tpu.memory_space<vmem>>) attributes {dimension_semantics = [#tpu.dimension_semantics<parallel>], iteration_bounds = array<i64: 1>, scalar_prefetch = 0 : i64, scratch_operands = 0 : i64, tpu.core_type = #tpu.core_type<tc>, window_params = [{transform_indices = @transform_0, window_bounds = array<i64: 16, 30>}, {pipeline_mode = #tpu.pipeline_mode<synchronous>, transform_indices = @transform_1, window_bounds = array<i64: 30, 128>}, {pipeline_mode = #tpu.pipeline_mode<synchronous>, transform_indices = @transform_2, window_bounds = array<i64: 1, 128>}, {pipeline_mode = #tpu.pipeline_mode<synchronous>, transform_indices = @transform_3, window_bounds = array<i64: 128, 128>}, {pipeline_mode = #tpu.pipeline_mode<synchronous>, transform_indices = @transform_4, window_bounds = array<i64: 1, 128>}, {pipeline_mode = #tpu.pipeline_mode<synchronous>, transform_indices = @transform_5, window_bounds = array<i64: 128, 128>}, {pipeline_mode = #tpu.pipeline_mode<synchronous>, transform_indices = @transform_6, window_bounds = array<i64: 1, 128>}, {pipeline_mode = #tpu.pipeline_mode<synchronous>, transform_indices = @transform_7, window_bounds = array<i64: 128, 1>}, {pipeline_mode = #tpu.pipeline_mode<synchronous>, transform_indices = @transform_8, window_bounds = array<i64: 1, 1>}, {transform_indices = @transform_9, window_bounds = array<i64: 16, 1>}]} {
    %c0 = arith.constant 0 : index
    %c0_0 = arith.constant 0 : index
    %0 = vector.load %arg1[%c0, %c0_0] : memref<16x30xf32, #tpu.memory_space<vmem>>, vector<16x30xf32>
    %c0_1 = arith.constant 0 : index
    %c0_2 = arith.constant 0 : index
    %1 = vector.load %arg2[%c0_1, %c0_2] : memref<30x128xf32, #tpu.memory_space<vmem>>, vector<30x128xf32>
    %cst = arith.constant dense<0.000000e+00> : vector<16x128xf32>
    %2 = tpu.matmul %0, %1, %cst {dimension_numbers = #tpu.dot_dimension_numbers<[1], [0], [0], [1], [0, 0, 1, 1], [], []>} : vector<16x30xf32>, vector<30x128xf32>, vector<16x128xf32> -> vector<16x128xf32>
    %c0_3 = arith.constant 0 : index
    %c0_4 = arith.constant 0 : index
    %3 = vector.load %arg3[%c0_3, %c0_4] : memref<1x128xf32, #tpu.memory_space<vmem>>, vector<1x128xf32>
    %4 = vector.broadcast %3 : vector<1x128xf32> to vector<16x128xf32>
    %5 = arith.addf %2, %4 : vector<16x128xf32>
    %cst_5 = arith.constant 0.00999999977 : f32
    %6 = vector.broadcast %cst_5 : f32 to vector<16x128xf32>
    %7 = arith.mulf %6, %5 : vector<16x128xf32>
    %8 = arith.maximumf %5, %7 : vector<16x128xf32>
    %c0_6 = arith.constant 0 : index
    %c0_7 = arith.constant 0 : index
    %9 = vector.load %arg4[%c0_6, %c0_7] : memref<128x128xf32, #tpu.memory_space<vmem>>, vector<128x128xf32>
    %cst_8 = arith.constant dense<0.000000e+00> : vector<16x128xf32>
    %10 = tpu.matmul %8, %9, %cst_8 {dimension_numbers = #tpu.dot_dimension_numbers<[1], [0], [0], [1], [0, 0, 1, 1], [], []>} : vector<16x128xf32>, vector<128x128xf32>, vector<16x128xf32> -> vector<16x128xf32>
    %c0_9 = arith.constant 0 : index
    %c0_10 = arith.constant 0 : index
    %11 = vector.load %arg5[%c0_9, %c0_10] : memref<1x128xf32, #tpu.memory_space<vmem>>, vector<1x128xf32>
    %12 = vector.broadcast %11 : vector<1x128xf32> to vector<16x128xf32>
    %13 = arith.addf %10, %12 : vector<16x128xf32>
    %cst_11 = arith.constant 0.00999999977 : f32
    %14 = vector.broadcast %cst_11 : f32 to vector<16x128xf32>
    %15 = arith.mulf %14, %13 : vector<16x128xf32>
    %16 = arith.maximumf %13, %15 : vector<16x128xf32>
    %17 = arith.negf %16 : vector<16x128xf32>
    %18 = math.exp %17 : vector<16x128xf32>
    %cst_12 = arith.constant 1.000000e+00 : f32
    %19 = vector.broadcast %cst_12 : f32 to vector<16x128xf32>
    %20 = arith.addf %19, %18 : vector<16x128xf32>
    %21 = arith.divf %19, %20 : vector<16x128xf32>
    %c0_13 = arith.constant 0 : index
    %c0_14 = arith.constant 0 : index
    %22 = vector.load %arg6[%c0_13, %c0_14] : memref<128x128xf32, #tpu.memory_space<vmem>>, vector<128x128xf32>
    %cst_15 = arith.constant dense<0.000000e+00> : vector<16x128xf32>
    %23 = tpu.matmul %21, %22, %cst_15 {dimension_numbers = #tpu.dot_dimension_numbers<[1], [0], [0], [1], [0, 0, 1, 1], [], []>} : vector<16x128xf32>, vector<128x128xf32>, vector<16x128xf32> -> vector<16x128xf32>
    %c0_16 = arith.constant 0 : index
    %c0_17 = arith.constant 0 : index
    %24 = vector.load %arg7[%c0_16, %c0_17] : memref<1x128xf32, #tpu.memory_space<vmem>>, vector<1x128xf32>
    %25 = vector.broadcast %24 : vector<1x128xf32> to vector<16x128xf32>
    %26 = arith.addf %23, %25 : vector<16x128xf32>
    %cst_18 = arith.constant 0.00999999977 : f32
    %27 = vector.broadcast %cst_18 : f32 to vector<16x128xf32>
    %28 = arith.mulf %27, %26 : vector<16x128xf32>
    %29 = arith.maximumf %26, %28 : vector<16x128xf32>
    %c0_19 = arith.constant 0 : index
    %c0_20 = arith.constant 0 : index
    %30 = vector.load %arg8[%c0_19, %c0_20] : memref<128x1xf32, #tpu.memory_space<vmem>>, vector<128x1xf32>
    %cst_21 = arith.constant dense<0.000000e+00> : vector<16x1xf32>
    %31 = tpu.matmul %29, %30, %cst_21 {dimension_numbers = #tpu.dot_dimension_numbers<[1], [0], [0], [1], [0, 0, 1, 1], [], []>} : vector<16x128xf32>, vector<128x1xf32>, vector<16x1xf32> -> vector<16x1xf32>
    %c0_22 = arith.constant 0 : index
    %c0_23 = arith.constant 0 : index
    %32 = vector.load %arg9[%c0_22, %c0_23] : memref<1x1xf32, #tpu.memory_space<vmem>>, vector<1x1xf32>
    %33 = vector.broadcast %32 : vector<1x1xf32> to vector<16x1xf32>
    %34 = arith.addf %31, %33 : vector<16x1xf32>
    %cst_24 = arith.constant 0.00999999977 : f32
    %35 = vector.broadcast %cst_24 : f32 to vector<16x1xf32>
    %36 = arith.mulf %35, %34 : vector<16x1xf32>
    %37 = arith.maximumf %34, %36 : vector<16x1xf32>
    %c0_25 = arith.constant 0 : index
    %c0_26 = arith.constant 0 : index
    %38 = vector.load %arg10[%c0_25, %c0_26] : memref<16x1xf32, #tpu.memory_space<vmem>>, vector<16x1xf32>
    tpu.vector_store %arg10[%c0_25, %c0_26], %37 {strides = array<i32>} : memref<16x1xf32, #tpu.memory_space<vmem>>, vector<16x1xf32>,
    return
  }
  func.func @transform_0(%arg0: i32) -> (i32, i32) {
    %c0_i32 = arith.constant 0 : i32
    %c0_i32_0 = arith.constant 0 : i32
    return %arg0, %c0_i32 : i32, i32
  }
  func.func @transform_1(%arg0: i32) -> (i32, i32) {
    %c0_i32 = arith.constant 0 : i32
    %c0_i32_0 = arith.constant 0 : i32
    %c0_i32_1 = arith.constant 0 : i32
    return %c0_i32, %c0_i32_0 : i32, i32
  }
  func.func @transform_2(%arg0: i32) -> (i32, i32) {
    %c0_i32 = arith.constant 0 : i32
    %c0_i32_0 = arith.constant 0 : i32
    %c0_i32_1 = arith.constant 0 : i32
    return %c0_i32, %c0_i32_0 : i32, i32
  }
  func.func @transform_3(%arg0: i32) -> (i32, i32) {
    %c0_i32 = arith.constant 0 : i32
    %c0_i32_0 = arith.constant 0 : i32
    %c0_i32_1 = arith.constant 0 : i32
    return %c0_i32, %c0_i32_0 : i32, i32
  }
  func.func @transform_4(%arg0: i32) -> (i32, i32) {
    %c0_i32 = arith.constant 0 : i32
    %c0_i32_0 = arith.constant 0 : i32
    %c0_i32_1 = arith.constant 0 : i32
    return %c0_i32, %c0_i32_0 : i32, i32
  }
  func.func @transform_5(%arg0: i32) -> (i32, i32) {
    %c0_i32 = arith.constant 0 : i32
    %c0_i32_0 = arith.constant 0 : i32
    %c0_i32_1 = arith.constant 0 : i32
    return %c0_i32, %c0_i32_0 : i32, i32
  }
  func.func @transform_6(%arg0: i32) -> (i32, i32) {
    %c0_i32 = arith.constant 0 : i32
    %c0_i32_0 = arith.constant 0 : i32
    %c0_i32_1 = arith.constant 0 : i32
    return %c0_i32, %c0_i32_0 : i32, i32
  }
  func.func @transform_7(%arg0: i32) -> (i32, i32) {
    %c0_i32 = arith.constant 0 : i32
    %c0_i32_0 = arith.constant 0 : i32
    %c0_i32_1 = arith.constant 0 : i32
    return %c0_i32, %c0_i32_0 : i32, i32
  }
  func.func @transform_8(%arg0: i32) -> (i32, i32) {
    %c0_i32 = arith.constant 0 : i32
    %c0_i32_0 = arith.constant 0 : i32
    %c0_i32_1 = arith.constant 0 : i32
    return %c0_i32, %c0_i32_0 : i32, i32
  }
  func.func @transform_9(%arg0: i32) -> (i32, i32) {
    %c0_i32 = arith.constant 0 : i32
    %c0_i32_0 = arith.constant 0 : i32
    return %arg0, %c0_i32 : i32, i32
  }
}

</mosaic_0001>

<bundles_post_ra>
// kernel: nn_forward.1
= control target key start
LH: loop header
LB: loop body
LE: loop exit
PB: predicated region body
PF: predicated region fallthrough
CT: control target
= control target key end

     0   :  { %s1012_s0 = inlined_call_operand.vmem [shape: f32[16,30], index: 0, kind: input, shape index: {}]   ;;  %s1013_s1 = inlined_call_operand.vmem [shape: f32[30,128], index: 1, kind: input, shape index: {}]   ;;  %s1014_s2 = inlined_call_operand.vmem [shape: f32[1,128], index: 2, kind: input, shape index: {}]   ;;  %s1015_s3 = inlined_call_operand.vmem [shape: f32[128,128], index: 3, kind: input, shape index: {}]   ;;  %s1016_s4 = inlined_call_operand.vmem [shape: f32[1,128], index: 4, kind: input, shape index: {}]   ;;  %s1017_s5 = inlined_call_operand.hbm [shape: f32[128,128], index: 5, kind: input, shape index: {}]   ;;  %s1018_s6 = inlined_call_operand.vmem [shape: f32[1,128], index: 6, kind: input, shape index: {}]   ;;  %s1019_s7 = inlined_call_operand.vmem [shape: f32[128,1], index: 7, kind: input, shape index: {}]   ;;  %s1020_s8 = inlined_call_operand.<no memory space> [shape: f32[1,1], index: 8, kind: input, shape index: {}]   ;;  %s1021_s9 = inlined_call_operand.vmem [shape: f32[16,1], index: 9, kind: output, shape index: {}]  }
   0x1   :  { %v14_v0 = vstv %s1020_s8 }
   0x2   :  { %15 = vst [vmem:[#allocation2] sm:$0x1] %v14_v0 }
   0x3   :  { %16 = vsyncpa [#allocation4], 0  ;;  %s804_s11 = smov [#allocation3]   ;;  %s780_s15 = scalar_lea.hbm %s1017_s5, 2048 }
   0x4   :  { %s32_s12 = sshll.u32 %s804_s11, 4  ;;  %p781_p0 = scmp.ne.s32.totalorder %s1017_s5, %s780_s15  ;;  %s33_s12 = int_to_ptr.vmem [resolvable:$true] %s32_s12 }
   0x5   :  { %p784_p1 = scmp.lt.u32.totalorder %s780_s15, %s1017_s5 }
   0x7   :  { %p786_p2 = pnand %p784_p1, %p781_p0 }
   0x9   :  { %789 = shalt.err (!%p786_p2)
}
   0xa   :  { %s790_s8 = scalar_lea.vmem %s33_s12, 2048  ;;  %p795_p4 = scmp.lt.s32.totalorder %s33_s12, %s33_s12 }
   0xb   :  { %p791_p3 = scmp.ne.s32.totalorder %s33_s12, %s790_s8  ;;  %p796_p5 = scmp.lt.s32.totalorder %s790_s8, %s790_s8 }
   0xd   :  { %p797_p6 = por %p796_p5, %p795_p4 }
   0xf   :  { %p798_p7 = pnand %p797_p6, %p791_p3 }
  0x11   :  { %801 = shalt.err (!%p798_p7)
}
  0x12   :  { %s805_s20 = smov 128   ;;  %s806_s21 = smov 8  }
  0x13   :  { %38 = dma.hbm_to_vmem [thread:$0]  %s1017_s5, 2048, %s33_s12, [#allocation4], %s805_s20, %s805_s20, %s806_s21  }
  0x14   :  { %802 = dma.done.wait [#allocation4], 2048  }
  0x15   :  { %803 = vsyncadd [#allocation4], 4294965248  ;;  %vm68_vm0 = vcmask 1045504   ;;  %vm61_vm1 = vcmask 244736   ;;  %v50_v1 = vld [vmem:[%s1013_s1] sm:$0xff]  ;;  %v51_v2 = vld [vmem:[%s1013_s1 + $0x8] sm:$0xff] }
  0x16   :  { %v52_v3 = vld [vmem:[%s1013_s1 + $0x10] sm:$0xff]  ;;  %v662_v4 = vpack.c.bf16 %v51_v2, %v50_v1  ;;  %v53_v5 = vld [vmem:[%s1013_s1 + $0x18] sm:$0x3f]  ;;  %vm807_vm2 = vmmov 1   ;;  %v48_v7 = vld [vmem:[%s1012_s0] sm:$0xff]  ;;  %vm469_vm4 = vcmask 7168  }
  0x17   :  { %vm885_vm3 = vmpackc.low %vm68_vm0, %vm807_vm2  ;;  %v666_v8 = vpack.c.bf16 %v53_v5, %v52_v3  ;;  %554 = vmatprep.mubr.msk.f32.mxu0 %vm61_vm1, %v48_v7  ;;  %v151_v9 = vld [vmem:[%s1015_s3] sm:$0xff]  ;;  %v152_v10 = vld [vmem:[%s1015_s3 + $0x8] sm:$0xff] }
  0x18   :  { %v153_v11 = vld [vmem:[%s1015_s3 + $0x10] sm:$0xff]  ;;  %663 = vmatprep.subr.bf16.mxu0 %v662_v4  ;;  %v672_v12 = vpack.c.bf16 %v152_v10, %v151_v9  ;;  %v154_v13 = vld [vmem:[%s1015_s3 + $0x18] sm:$0xff]  ;;  %v155_v15 = vld [vmem:[%s1015_s3 + $0x20] sm:$0xff] }
  0x19   :  { %665 = vmatpush3.bf16.msra.mxu0 %v662_v4  ;;  %v676_v14 = vpack.c.bf16 %v154_v13, %v153_v11  ;;  %v156_v16 = vld [vmem:[%s1015_s3 + $0x28] sm:$0xff]  ;;  %v157_v19 = vld [vmem:[%s1015_s3 + $0x30] sm:$0xff]  ;;  %v158_v20 = vld [vmem:[%s1015_s3 + $0x38] sm:$0xff] }
  0x1a   :  { %668 = vmatprep.subr.msk.bf16.mxu0 %vm885_vm3, %v666_v8  ;;  %673 = vmatprep.subr.bf16.mxu1 %v672_v12  ;;  %v680_v17 = vpack.c.bf16 %v156_v16, %v155_v15  ;;  %v49_v18 = vld [vmem:[%s1012_s0 + $0x8] sm:$0xff]  ;;  %v684_v21 = vpack.c.bf16 %v158_v20, %v157_v19  ;;  %v159_v22 = vld [vmem:[%s1015_s3 + $0x40] sm:$0xff]  ;;  %v161_v25 = vld [vmem:[%s1015_s3 + $0x50] sm:$0xff] }
  0x1b   :  { %675 = vmatpush3.bf16.msra.mxu1 %v672_v12  ;;  %v160_v23 = vld [vmem:[%s1015_s3 + $0x48] sm:$0xff]  ;;  %v162_v26 = vld [vmem:[%s1015_s3 + $0x58] sm:$0xff]  ;;  %v163_v28 = vld [vmem:[%s1015_s3 + $0x60] sm:$0xff] }
  0x1c   :  { %677 = vmatprep.subr.bf16.mxu1 %v676_v14  ;;  %v688_v24 = vpack.c.bf16 %v160_v23, %v159_v22  ;;  %v692_v27 = vpack.c.bf16 %v162_v26, %v161_v25  ;;  %v164_v29 = vld [vmem:[%s1015_s3 + $0x68] sm:$0xff]  ;;  %v165_v31 = vld [vmem:[%s1015_s3 + $0x70] sm:$0xff]  ;;  %v166_v32 = vld [vmem:[%s1015_s3 + $0x78] sm:$0xff] }
  0x1d   :  { %671 = vmatpush3.bf16.msk.msra.mxu0 %vm885_vm3, %v666_v8  ;;  %v696_v30 = vpack.c.bf16 %v164_v29, %v163_v28  ;;  %v700_v33 = vpack.c.bf16 %v166_v32, %v165_v31  ;;  %v477_v34 = vld [vmem:[%s1014_s2] ss:$0 sm:$0xff]  ;;  %v265_v43 = vld [vmem:[#allocation3] sm:$0xff]  ;;  %v266_v44 = vld [vmem:[#allocation3 + $0x8] sm:$0xff] }
  0x1e   :  { %v704_v45 = vpack.c.bf16 %v266_v44, %v265_v43  ;;  %v267_v46 = vld [vmem:[#allocation3 + $0x10] sm:$0xff]  ;;  %v268_v47 = vld [vmem:[#allocation3 + $0x18] sm:$0xff]  ;;  %v269_v49 = vld [vmem:[#allocation3 + $0x20] sm:$0xff] }
  0x1f   :  { %679 = vmatpush3.bf16.msra.mxu1 %v676_v14  ;;  %v708_v48 = vpack.c.bf16 %v268_v47, %v267_v46  ;;  %v270_v50 = vld [vmem:[#allocation3 + $0x28] sm:$0xff]  ;;  %v271_v52 = vld [vmem:[#allocation3 + $0x30] sm:$0xff]  ;;  %v272_v53 = vld [vmem:[#allocation3 + $0x38] sm:$0xff] }
  0x20   :  { %555 = vmatmul.mubr.msk.f32.vlgmr.msra.gmra.mrb[0].mxu0 %vm61_vm1, %v49_v18  ;;  %681 = vmatprep.subr.bf16.mxu1 %v680_v17  ;;  %v712_v51 = vpack.c.bf16 %v270_v50, %v269_v49  ;;  %v716_v54 = vpack.c.bf16 %v272_v53, %v271_v52  ;;  %v273_v55 = vld [vmem:[#allocation3 + $0x40] sm:$0xff]  ;;  %v274_v56 = vld [vmem:[#allocation3 + $0x48] sm:$0xff]  ;;  %v275_v58 = vld [vmem:[#allocation3 + $0x50] sm:$0xff] }
  0x21   :  { %705 = vmatprep.subr.bf16.mxu0 %v704_v45  ;;  %v720_v57 = vpack.c.bf16 %v274_v56, %v273_v55  ;;  %v276_v59 = vld [vmem:[#allocation3 + $0x58] sm:$0xff]  ;;  %v277_v61 = vld [vmem:[#allocation3 + $0x60] sm:$0xff]  ;;  %v278_v62 = vld [vmem:[#allocation3 + $0x68] sm:$0xff] }
  0x22   :  { %707 = vmatpush3.bf16.msra.mxu0 %v704_v45  ;;  %v724_v60 = vpack.c.bf16 %v276_v59, %v275_v58  ;;  %v279_v63 = vld [vmem:[#allocation3 + $0x70] sm:$0xff]  ;;  %v728_v0 = vpack.c.bf16 %v278_v62, %v277_v61  ;;  %v280_v1 = vld [vmem:[#allocation3 + $0x78] sm:$0xff]  ;;  %v368_v4 = vld [vmem:[%s1019_s7 + $0x8] sm:$0xff] }
  0x23   :  { %683 = vmatpush3.bf16.msra.mxu1 %v680_v17  ;;  %709 = vmatprep.subr.bf16.mxu0 %v708_v48  ;;  %v732_v2 = vpack.c.bf16 %v280_v1, %v279_v63  ;;  %v367_v3 = vld [vmem:[%s1019_s7] sm:$0xff]  ;;  %v369_v5 = vld [vmem:[%s1019_s7 + $0x10] sm:$0xff]  ;;  %v370_v7 = vld [vmem:[%s1019_s7 + $0x18] sm:$0xff] }
  0x24   :  { %685 = vmatprep.subr.bf16.mxu1 %v684_v21  ;;  %v736_v6 = vpack.c.bf16 %v368_v4, %v367_v3  ;;  %v740_v8 = vpack.c.bf16 %v370_v7, %v369_v5  ;;  %v371_v9 = vld [vmem:[%s1019_s7 + $0x20] sm:$0xff]  ;;  %v372_v10 = vld [vmem:[%s1019_s7 + $0x28] sm:$0xff]  ;;  %v373_v12 = vld [vmem:[%s1019_s7 + $0x30] sm:$0xff] }
  0x25   :  { %v744_v11 = vpack.c.bf16 %v372_v10, %v371_v9  ;;  %v374_v13 = vld [vmem:[%s1019_s7 + $0x38] sm:$0xff]  ;;  %v375_v15 = vld [vmem:[%s1019_s7 + $0x40] sm:$0xff]  ;;  %v376_v16 = vld [vmem:[%s1019_s7 + $0x48] sm:$0xff] }
  0x26   :  { %711 = vmatpush3.bf16.msra.mxu0 %v708_v48  ;;  %v748_v14 = vpack.c.bf16 %v374_v13, %v373_v12  ;;  %v752_v17 = vpack.c.bf16 %v376_v16, %v375_v15  ;;  %v377_v18 = vld [vmem:[%s1019_s7 + $0x50] sm:$0xff]  ;;  %v378_v19 = vld [vmem:[%s1019_s7 + $0x58] sm:$0xff]  ;;  %v484_v44 = vld [vmem:[%s1018_s6] ss:$0 sm:$0xff] }
  0x27   :  { %687 = vmatpush3.bf16.msra.mxu1 %v684_v21  ;;  %713 = vmatprep.subr.bf16.mxu0 %v712_v51  ;;  %v756_v20 = vpack.c.bf16 %v378_v19, %v377_v18  ;;  %v481_v21 = vld [vmem:[%s1016_s4] ss:$0 sm:$0xff] }
  0x28   :  { %689 = vmatprep.subr.bf16.mxu1 %v688_v24  ;;  %v485_v53 = vld [vmem:[#allocation2] ss:$0 sm:$0xff] }
  0x2a   :  { %715 = vmatpush3.bf16.msra.mxu0 %v712_v51 }
  0x2b   :  { %691 = vmatpush3.bf16.msra.mxu1 %v688_v24  ;;  %717 = vmatprep.subr.bf16.mxu0 %v716_v54 }
  0x2c   :  { %693 = vmatprep.subr.bf16.mxu1 %v692_v27 }
  0x2e   :  { %719 = vmatpush3.bf16.msra.mxu0 %v716_v54 }
  0x2f   :  { %695 = vmatpush3.bf16.msra.mxu1 %v692_v27  ;;  %721 = vmatprep.subr.bf16.mxu0 %v720_v57 }
  0x30   :  { %697 = vmatprep.subr.bf16.mxu1 %v696_v30 }
  0x32   :  { %723 = vmatpush3.bf16.msra.mxu0 %v720_v57 }
  0x33   :  { %699 = vmatpush3.bf16.msra.mxu1 %v696_v30  ;;  %725 = vmatprep.subr.bf16.mxu0 %v724_v60 }
  0x34   :  { %701 = vmatprep.subr.bf16.mxu1 %v700_v33 }
  0x36   :  { %727 = vmatpush3.bf16.msra.mxu0 %v724_v60 }
  0x37   :  { %703 = vmatpush3.bf16.msra.mxu1 %v700_v33  ;;  %729 = vmatprep.subr.bf16.mxu0 %v728_v0 }
  0x38   :  { %737 = vmatprep.subr.bf16.mxu1 %v736_v6 }
  0x3a   :  { %731 = vmatpush3.bf16.msra.mxu0 %v728_v0 }
  0x3b   :  { %733 = vmatprep.subr.bf16.mxu0 %v732_v2 }
  0x3e   :  { %735 = vmatpush3.bf16.msra.mxu0 %v732_v2 }
  0xf3   :  { %v556_v35 = vpop.f32.mrb[0].mxu0 }
  0xf4   :  { %v144_v36 = vadd.f32 %v556_v35, %v477_v34  ;;  %v138_v37 = vpop.f32.mrb[1].mxu0 }
  0xf5   :  { %v139_v38 = vadd.f32 %v477_v34, %v138_v37 }
  0xf6   :  { %v148_v39 = vmul.f32 0.01, %v144_v36 }
  0xf7   :  { %v147_v40 = vmul.f32 0.01, %v139_v38 }
  0xf8   :  { %v150_v42 = vmax.f32 %v144_v36, %v148_v39  ;;  %v380_v39 = vld [vmem:[%s1019_s7 + $0x68] sm:$0xff] }
  0xf9   :  { %v149_v41 = vmax.f32 %v139_v38, %v147_v40  ;;  %v379_v38 = vld [vmem:[%s1019_s7 + $0x60] sm:$0xff] }
  0xfa   :  { %v760_v40 = vpack.c.bf16 %v380_v39, %v379_v38 }
  0xfb   :  { %589 = vmatprep.mubr.f32.mxu1 %v149_v41  ;;  %v381_v41 = vld [vmem:[%s1019_s7 + $0x70] sm:$0xff] }
  0xfc   :  { %590 = vmatmul.mubr.f32.vlgmr.msra.gmra.mrb[0].mxu1 %v150_v42  ;;  %v382_v42 = vld [vmem:[%s1019_s7 + $0x78] sm:$0xff] }
  0xfd   :  { %739 = vmatpush3.bf16.msra.mxu1 %v736_v6  ;;  %v764_v43 = vpack.c.bf16 %v382_v42, %v381_v41 }
  0xfe   :  { %741 = vmatprep.subr.bf16.mxu1 %v740_v8 }
 0x101   :  { %743 = vmatpush3.bf16.msra.mxu1 %v740_v8 }
 0x102   :  { %745 = vmatprep.subr.bf16.mxu1 %v744_v11 }
 0x105   :  { %747 = vmatpush3.bf16.msra.mxu1 %v744_v11 }
 0x106   :  { %749 = vmatprep.subr.bf16.mxu1 %v748_v14 }
 0x109   :  { %751 = vmatpush3.bf16.msra.mxu1 %v748_v14 }
 0x10a   :  { %753 = vmatprep.subr.bf16.mxu1 %v752_v17 }
 0x10d   :  { %755 = vmatpush3.bf16.msra.mxu1 %v752_v17 }
 0x10e   :  { %757 = vmatprep.subr.bf16.mxu1 %v756_v20 }
 0x111   :  { %759 = vmatpush3.bf16.msra.mxu1 %v756_v20 }
 0x112   :  { %761 = vmatprep.subr.bf16.mxu1 %v760_v40 }
 0x115   :  { %763 = vmatpush3.bf16.msra.mxu1 %v760_v40 }
 0x116   :  { %765 = vmatprep.subr.bf16.mxu1 %v764_v43 }
 0x119   :  { %767 = vmatpush3.bf16.msra.mxu1 %v764_v43 }
 0x1cf   :  { %v591_v22 = vpop.f32.mrb[0].mxu1 }
 0x1d0   :  { %v246_v23 = vadd.f32 %v591_v22, %v481_v21  ;;  %v240_v24 = vpop.f32.mrb[1].mxu1 }
 0x1d1   :  { %v241_v25 = vadd.f32 %v481_v21, %v240_v24 }
 0x1d2   :  { %v250_v26 = vmul.f32 0.01, %v246_v23 }
 0x1d3   :  { %v249_v27 = vmul.f32 0.01, %v241_v25 }
 0x1d4   :  { %v252_v28 = vmax.f32 %v246_v23, %v250_v26 }
 0x1d5   :  { %v251_v29 = vmax.f32 %v241_v25, %v249_v27 }
 0x1d6   :  { %v483_v30 = vmul.f32 -1.442695, %v252_v28 }
 0x1d7   :  { %v482_v31 = vmul.f32 -1.442695, %v251_v29 }
 0x1d8   :  { %772 = vpow2.f32 %v483_v30 }
 0x1d9   :  { %774 = vpow2.f32 %v482_v31 }
 0x1e2   :  { %v773_v32 = vpop.eup %772 }
 0x1e3   :  { %v775_v33 = vpop.eup %774  ;;  %v260_v34 = vadd.f32 1.0, %v773_v32 }
 0x1e4   :  { %v259_v35 = vadd.f32 1.0, %v775_v33 }
 0x1e6   :  { %776 = vrcp.f32 %v259_v35 }
 0x1e7   :  { %778 = vrcp.f32 %v260_v34 }
 0x1f0   :  { %v777_v36 = vpop.eup %776 }
 0x1f1   :  { %v779_v37 = vpop.eup %778  ;;  %624 = vmatprep.mubr.f32.mxu0 %v777_v36 }
 0x1f2   :  { %625 = vmatmul.mubr.f32.vlgmr.msra.gmra.mrb[2].mxu0 %v779_v37 }
 0x2c5   :  { %v626_v45 = vpop.f32.mrb[2].mxu0 }
 0x2c6   :  { %v360_v46 = vadd.f32 %v626_v45, %v484_v44  ;;  %v354_v47 = vpop.f32.mrb[3].mxu0 }
 0x2c7   :  { %v355_v48 = vadd.f32 %v484_v44, %v354_v47 }
 0x2c8   :  { %v364_v49 = vmul.f32 0.01, %v360_v46 }
 0x2c9   :  { %v363_v50 = vmul.f32 0.01, %v355_v48 }
 0x2ca   :  { %v366_v52 = vmax.f32 %v360_v46, %v364_v49 }
 0x2cb   :  { %v365_v51 = vmax.f32 %v355_v48, %v363_v50 }
 0x2cd   :  { %659 = vmatprep.mubr.f32.mxu1 %v365_v51 }
 0x2ce   :  { %660 = vmatmul.mubr.f32.vlgmr.msra.gmra.mrb[2].mxu1 %v366_v52 }
 0x3a1   :  { %v661_v54 = vpop.f32.mrb[2].mxu1 }
 0x3a2   :  { %v462_v55 = vadd.f32 %v661_v54, %v485_v53  ;;  %v456_v56 = vpop.f32.mrb[3].mxu1 }
 0x3a3   :  { %v457_v57 = vadd.f32 %v485_v53, %v456_v56 }
 0x3a4   :  { %v466_v58 = vmul.f32 0.01, %v462_v55 }
 0x3a5   :  { %v465_v59 = vmul.f32 0.01, %v457_v57 }
 0x3a6   :  { %v468_v60 = vmax.f32 %v462_v55, %v466_v58 }
 0x3a7   :  { %v467_v61 = vmax.f32 %v457_v57, %v465_v59 }
 0x3a8   :  { %471 = vst.msk [vmem:[%s1021_s9 + $0x8] sm:$0xff] %vm469_vm4, %v468_v60 }
 0x3a9   :  { %470 = vst.msk [vmem:[%s1021_s9] sm:$0xff] %vm469_vm4, %v467_v61 }
 0x3aa   :  { %476 = vsyncpa [#allocation4], 1 }

</bundles_post_ra>
